<compile_context>
chip_gen: v5e
topology: v5e:2x2
jax: 0.10.0
libtpu: 0.0.40
codegen_flags: <defaults>
</compile_context>

<pallas_src>
import jax
import jax.numpy as jnp
from jax.experimental import pallas as pl
from jax.experimental.pallas import tpu as pltpu


def edge_nn_kernel(x_ref, w_ref, b_ref, o_ref):
    # x_ref: [TN, F]   (unpadded feature axis; TN may be a partial last tile)
    # w_ref: [Fp, Fp]  (weight.T, zero-padded outside [:F, :F])
    # b_ref: [1,  Fp]  (bias, zero-padded)
    # o_ref: [TN, F]
    f = x_ref.shape[-1]                      # static true feature count
    w = w_ref[...]
    b = b_ref[...].astype(jnp.float32)       # hoisted once, reused for both adds

    # First application of the shared linear layer + ReLU (MXU, f32 accumulate).
    x = x_ref[...].astype(w.dtype)           # in-vreg cast (bf16 path); no-op for f32
    h = jnp.dot(x, w[:f, :], preferred_element_type=jnp.float32) + b
    h = jnp.maximum(h, 0.0)

    # Second application of the SAME weights + ReLU.  Padded columns of h are
    # exactly 0 (zero weight cols + zero bias + ReLU) and the padded rows of w
    # are 0, so the first F output columns are exact.
    h = jnp.dot(h.astype(w.dtype), w, preferred_element_type=jnp.float32) + b
    h = jnp.maximum(h, 0.0)

    o_ref[...] = h[:, :f].astype(o_ref.dtype)


def _choose_tile_n(n, tile_n):
    """Pick the N tile: multiple of 8, big enough to amortize per-step overhead,
    small enough that v7x's two TensorCores both get work."""
    n_round8 = max(8, ((n + 7) // 8) * 8)
    tn = min(int(tile_n), n_round8)
    # Prefer >= 4 grid steps for pipelining once tiles can stay >= 512 rows.
    if n_round8 >= 4 * 512:
        quarter = ((-(-n_round8 // 4)) + 7) // 8 * 8
        tn = min(tn, max(quarter, 512))
    # Guarantee >= 2 N tiles whenever there is enough work so that
    # dimension_semantics=('parallel',) shards across both TCs on v7x.
    if n_round8 >= 16:
        half = ((-(-n_round8 // 2)) + 7) // 8 * 8
        tn = min(tn, half)
    return max(8, (tn // 8) * 8)


def _vmem_limit_bytes(tn, f, f_pad, x_dtype, w_dtype):
    """Budget VMEM from the actual buffers instead of a hard-coded constant."""
    xb = jnp.dtype(x_dtype).itemsize
    wb = jnp.dtype(w_dtype).itemsize
    est = (
        2 * tn * f * xb            # x tiles, double-buffered
        + 2 * tn * f * xb          # out tiles, double-buffered
        + f_pad * f_pad * wb       # W, single-buffered (constant index_map)
        + f_pad * 4                # bias
        + 2 * tn * f_pad * 4       # f32 intermediates of the two matmuls
    )
    try:
        phys = pltpu.get_tpu_info().vmem_capacity_bytes
    except Exception:
        phys = 64 * 1024 * 1024    # assume the smallest (v7x per-TC) if unknown
    limit = int(est * 1.5) + (4 << 20)          # headroom for compiler scratch
    return max(min(limit, int(phys) * 3 // 4), 16 << 20)


def edge_nn_forward(x, weight, bias, *, tile_n=1024, matmul_dtype=None):
    """x: [N, F]; weight: [F, F] (PyTorch layout, out x in); bias: [F]."""
    n, f = x.shape
    f_pad = pl.cdiv(f, 128) * 128

    # MXU input dtype: bf16 once the kernel is MXU-bound (full-rate on v6e/v7x,
    # halves W's footprint/traffic); keep x.dtype (f32) at small F where the
    # kernel is HBM-bound and exact parity with the f32 reference is free.
    if matmul_dtype is None:
        matmul_dtype = jnp.bfloat16 if f_pad >= 512 else x.dtype
    matmul_dtype = jnp.dtype(matmul_dtype)

    # Zero-pad only the (tiny) parameters; x / out stay unpadded in HBM.
    w_t = weight.T.astype(matmul_dtype)                      # [F_in, F_out]
    if f_pad == f:
        w_p = w_t
        b_p = bias.reshape(1, f)
    else:
        w_p = jnp.zeros((f_pad, f_pad), matmul_dtype).at[:f, :f].set(w_t)
        b_p = jnp.zeros((1, f_pad), bias.dtype).at[0, :f].set(bias)

    tn = _choose_tile_n(n, tile_n)
    grid = (pl.cdiv(n, tn),)                                 # last tile may be partial

    resident = pl.Buffered(buffer_count=1)                   # constant index_map => 1 buffer

    # TODO(synk): for F_pad large enough that a resident W no longer fits in
    # VMEM (~>4-5k bf16 on v7x's 64 MiB), switch to a K-tiled grid with an f32
    # accumulator (two chained pallas_calls, one per linear application).
    out = pl.pallas_call(
        edge_nn_kernel,
        out_shape=jax.ShapeDtypeStruct((n, f), x.dtype),
        grid_spec=pl.GridSpec(
            grid=grid,
            in_specs=[
                pl.BlockSpec((tn, f), lambda i: (i, 0)),                  # x tiles (pipelined)
                pl.BlockSpec((f_pad, f_pad), lambda i: (0, 0),
                             pipeline_mode=resident),                     # W resident
                pl.BlockSpec((1, f_pad), lambda i: (0, 0),
                             pipeline_mode=resident),                     # bias resident
            ],
            out_specs=pl.BlockSpec((tn, f), lambda i: (i, 0)),
        ),
        compiler_params=pltpu.CompilerParams(
            dimension_semantics=("parallel",),       # shard N tiles across TCs (v7x)
            vmem_limit_bytes=_vmem_limit_bytes(tn, f, f_pad, x.dtype, matmul_dtype),
        ),
    )(x, w_p, b_p)
    return out


def reference_forward(x, weight, bias):
    h = jnp.maximum(x @ weight.T + bias, 0.0)
    h = jnp.maximum(h @ weight.T + bias, 0.0)
    return h


if __name__ == "__main__":
    in_feats = 32
    batch = 8

    key = jax.random.PRNGKey(0)
    kx, kw, kb = jax.random.split(key, 3)

    # Deterministic synthetic parameters (PyTorch-style uniform(-1/sqrt(F), 1/sqrt(F))).
    bound = 1.0 / (in_feats ** 0.5)
    weight = jax.random.uniform(kw, (in_feats, in_feats), jnp.float32, -bound, bound)
    bias = jax.random.uniform(kb, (in_feats,), jnp.float32, -bound, bound)
    x = jax.random.normal(kx, (batch, in_feats), jnp.float32)

    out = jax.block_until_ready(edge_nn_forward(x, weight, bias))
    ref = reference_forward(x, weight, bias)
    assert out.shape == (batch, in_feats)
    assert jnp.allclose(out, ref, atol=1e-5, rtol=1e-5), "f32 path mismatch"

    # Exercise the partial-last-tile path (N not a multiple of the tile) and
    # the bf16-MXU path at a lane-aligned F (looser tolerance for bf16 inputs).
    n2, f2 = 300, 128
    k2x, k2w, k2b = jax.random.split(jax.random.PRNGKey(0), 3)
    bound2 = 1.0 / (f2 ** 0.5)
    x2 = jax.random.normal(k2x, (n2, f2), jnp.float32)
    w2 = jax.random.uniform(k2w, (f2, f2), jnp.float32, -bound2, bound2)
    b2 = jax.random.uniform(k2b, (f2,), jnp.float32, -bound2, bound2)
    out2 = jax.block_until_ready(
        edge_nn_forward(x2, w2, b2, tile_n=128, matmul_dtype=jnp.bfloat16))
    ref2 = reference_forward(x2, w2, b2)
    assert out2.shape == (n2, f2)
    assert jnp.allclose(out2, ref2, atol=3e-2, rtol=3e-2), "bf16 path mismatch"

    print("KERNEL_OK")
</pallas_src>

<mosaic_0001>
module attributes {stable_mosaic.version = 11 : i64} {
  func.func @edge_nn_kernel(%arg0: i32, %arg1: memref<8x32xf32, #tpu.memory_space<vmem>>, %arg2: memref<128x128xf32, #tpu.memory_space<vmem>>, %arg3: memref<1x128xf32, #tpu.memory_space<vmem>>, %arg4: memref<8x32xf32, #tpu.memory_space<vmem>>) attributes {dimension_semantics = [#tpu.dimension_semantics<parallel>], iteration_bounds = array<i64: 1>, scalar_prefetch = 0 : i64, scratch_operands = 0 : i64, tpu.core_type = #tpu.core_type<tc>, window_params = [{transform_indices = @transform_0, window_bounds = array<i64: 8, 32>}, {pipeline_mode = #tpu.pipeline_mode<synchronous>, transform_indices = @transform_1, window_bounds = array<i64: 128, 128>}, {pipeline_mode = #tpu.pipeline_mode<synchronous>, transform_indices = @transform_2, window_bounds = array<i64: 1, 128>}, {transform_indices = @transform_3, window_bounds = array<i64: 8, 32>}]} {
    %c0 = arith.constant 0 : index
    %c0_0 = arith.constant 0 : index
    %0 = vector.load %arg2[%c0, %c0_0] : memref<128x128xf32, #tpu.memory_space<vmem>>, vector<128x128xf32>
    %c0_1 = arith.constant 0 : index
    %c0_2 = arith.constant 0 : index
    %1 = vector.load %arg3[%c0_1, %c0_2] : memref<1x128xf32, #tpu.memory_space<vmem>>, vector<1x128xf32>
    %c0_3 = arith.constant 0 : index
    %c0_4 = arith.constant 0 : index
    %2 = vector.load %arg1[%c0_3, %c0_4] : memref<8x32xf32, #tpu.memory_space<vmem>>, vector<8x32xf32>
    %3 = vector.extract_strided_slice %0 {offsets = [0, 0], sizes = [32, 128], strides = [1, 1]} : vector<128x128xf32> to vector<32x128xf32>
    %cst = arith.constant dense<0.000000e+00> : vector<8x128xf32>
    %4 = tpu.matmul %2, %3, %cst {dimension_numbers = #tpu.dot_dimension_numbers<[1], [0], [0], [1], [0, 0, 1, 1], [], []>} : vector<8x32xf32>, vector<32x128xf32>, vector<8x128xf32> -> vector<8x128xf32>
    %5 = vector.broadcast %1 : vector<1x128xf32> to vector<8x128xf32>
    %6 = arith.addf %4, %5 : vector<8x128xf32>
    %cst_5 = arith.constant 0.000000e+00 : f32
    %7 = vector.broadcast %cst_5 : f32 to vector<8x128xf32>
    %8 = arith.maximumf %6, %7 : vector<8x128xf32>
    %cst_6 = arith.constant dense<0.000000e+00> : vector<8x128xf32>
    %9 = tpu.matmul %8, %0, %cst_6 {dimension_numbers = #tpu.dot_dimension_numbers<[1], [0], [0], [1], [0, 0, 1, 1], [], []>} : vector<8x128xf32>, vector<128x128xf32>, vector<8x128xf32> -> vector<8x128xf32>
    %10 = vector.broadcast %1 : vector<1x128xf32> to vector<8x128xf32>
    %11 = arith.addf %9, %10 : vector<8x128xf32>
    %cst_7 = arith.constant 0.000000e+00 : f32
    %12 = vector.broadcast %cst_7 : f32 to vector<8x128xf32>
    %13 = arith.maximumf %11, %12 : vector<8x128xf32>
    %14 = vector.extract_strided_slice %13 {offsets = [0, 0], sizes = [8, 32], strides = [1, 1]} : vector<8x128xf32> to vector<8x32xf32>
    %c0_8 = arith.constant 0 : index
    %c0_9 = arith.constant 0 : index
    %15 = vector.load %arg4[%c0_8, %c0_9] : memref<8x32xf32, #tpu.memory_space<vmem>>, vector<8x32xf32>
    tpu.vector_store %arg4[%c0_8, %c0_9], %14 {strides = array<i32>} : memref<8x32xf32, #tpu.memory_space<vmem>>, vector<8x32xf32>,
    return
  }
  func.func @transform_0(%arg0: i32) -> (i32, i32) {
    %c0_i32 = arith.constant 0 : i32
    %c0_i32_0 = arith.constant 0 : i32
    return %arg0, %c0_i32 : i32, i32
  }
  func.func @transform_1(%arg0: i32) -> (i32, i32) {
    %c0_i32 = arith.constant 0 : i32
    %c0_i32_0 = arith.constant 0 : i32
    %c0_i32_1 = arith.constant 0 : i32
    return %c0_i32, %c0_i32_0 : i32, i32
  }
  func.func @transform_2(%arg0: i32) -> (i32, i32) {
    %c0_i32 = arith.constant 0 : i32
    %c0_i32_0 = arith.constant 0 : i32
    %c0_i32_1 = arith.constant 0 : i32
    return %c0_i32, %c0_i32_0 : i32, i32
  }
  func.func @transform_3(%arg0: i32) -> (i32, i32) {
    %c0_i32 = arith.constant 0 : i32
    %c0_i32_0 = arith.constant 0 : i32
    return %arg0, %c0_i32 : i32, i32
  }
}

</mosaic_0001>

<bundles_post_ra>
// kernel: tpu_custom_call.1
= control target key start
LH: loop header
LB: loop body
LE: loop exit
PB: predicated region body
PF: predicated region fallthrough
CT: control target
= control target key end

     0   :  { %8 = vsyncpa [#allocation3], 0  ;;  %s255_s0 = inlined_call_operand.hbm [shape: f32[8,32], index: 0, kind: input, shape index: {}]   ;;  %s256_s1 = inlined_call_operand.hbm [shape: f32[128,128], index: 1, kind: input, shape index: {}]   ;;  %s257_s2 = inlined_call_operand.vmem [shape: f32[1,128], index: 2, kind: input, shape index: {}]   ;;  %s258_s3 = inlined_call_operand.hbm [shape: f32[8,32], index: 3, kind: output, shape index: {}]  }
   0x1   :  { %9 = vsyncpa [#allocation6], 0 }
   0x2   :  { %10 = vsyncpa [#allocation4], 0  ;;  %s16_s14 = sshll.u32 %s255_s0, 4  ;;  %s216_s15 = smov [#allocation2]   ;;  %s17_s14 = int_to_ptr.hbm [resolvable:$true] %s16_s14 }
   0x3   :  { %s18_s16 = sshll.u32 %s216_s15, 4  ;;  %s26_s19 = sshll.u32 %s256_s1, 4  ;;  %s19_s16 = int_to_ptr.vmem [resolvable:$true] %s18_s16  ;;  %s27_s19 = int_to_ptr.hbm [resolvable:$true] %s26_s19 }
   0x4   :  { %21 = dma.hbm_to_vmem [thread:$0]  %s17_s14, 128, %s19_s16, [#allocation3]  }
   0x5   :  { %s217_s20 = smov [#allocation5]   ;;  %s218_s22 = smov 128  }
   0x6   :  { %s28_s21 = sshll.u32 %s217_s20, 4  ;;  %s219_s23 = smov 8   ;;  %s29_s21 = int_to_ptr.vmem [resolvable:$true] %s28_s21 }
   0x7   :  { %34 = dma.hbm_to_vmem [thread:$0]  %s27_s19, 2048, %s29_s21, [#allocation6], %s218_s22, %s218_s22, %s219_s23  }
   0x8   :  { %210 = dma.done.wait [#allocation3], 128  }
   0x9   :  { %211 = vsyncadd [#allocation3], 4294967168 }
   0xa   :  { %212 = dma.done.wait [#allocation6], 2048  }
   0xb   :  { %213 = vsyncadd [#allocation6], 4294965248  ;;  %v48_v0 = vld [vmem:[#allocation5 + $0x18] sm:$0xff]  ;;  %v47_v1 = vld [vmem:[#allocation5 + $0x10] sm:$0xff]  ;;  %vm66_vm0 = vcmask 261120   ;;  %s220_s24 = smov [#allocation7]  }
   0xc   :  { %82 = vmatpush.msra.mxu0 %v48_v0  ;;  %v60_v2 = vld [vmem:[#allocation5 + $0x78] sm:$0xff]  ;;  %v46_v3 = vld [vmem:[#allocation5 + $0x8] sm:$0xff]  ;;  %v59_v4 = vld [vmem:[#allocation5 + $0x70] sm:$0xff]  ;;  %s118_s25 = sshll.u32 %s220_s24, 4  ;;  %s120_s28 = sshll.u32 %s258_s3, 4  ;;  %s119_s25 = int_to_ptr.vmem [resolvable:$true] %s118_s25  ;;  %s121_s28 = int_to_ptr.hbm [resolvable:$true] %s120_s28 }
   0xd   :  { %91 = vmatpush.msra.mxu1 %v60_v2  ;;  %v58_v5 = vld [vmem:[#allocation5 + $0x68] sm:$0xff]  ;;  %v45_v6 = vld [vmem:[#allocation5] sm:$0xff]  ;;  %v62_v7 = vld [vmem:[#allocation2] sm:$0xff] }
   0xe   :  { %83 = vmatpush.msra.mxu0 %v47_v1  ;;  %v57_v8 = vld [vmem:[#allocation5 + $0x60] sm:$0xff]  ;;  %v56_v9 = vld [vmem:[#allocation5 + $0x58] sm:$0xff]  ;;  %v55_v10 = vld [vmem:[#allocation5 + $0x50] sm:$0xff] }
   0xf   :  { %92 = vmatpush.msra.mxu1 %v59_v4  ;;  %v54_v11 = vld [vmem:[#allocation5 + $0x48] sm:$0xff]  ;;  %v53_v12 = vld [vmem:[#allocation5 + $0x40] sm:$0xff]  ;;  %v52_v13 = vld [vmem:[#allocation5 + $0x38] sm:$0xff] }
  0x10   :  { %84 = vmatpush.msra.mxu0 %v46_v3  ;;  %v51_v14 = vld [vmem:[#allocation5 + $0x30] sm:$0xff]  ;;  %v50_v15 = vld [vmem:[#allocation5 + $0x28] sm:$0xff]  ;;  %v49_v16 = vld [vmem:[#allocation5 + $0x20] sm:$0xff] }
  0x11   :  { %93 = vmatpush.msra.mxu1 %v58_v5  ;;  %v137_v17 = vld [vmem:[%s257_s2] ss:$0 sm:$0xff] }
  0x12   :  { %85 = vmatpush.msra.mxu0 %v45_v6 }
  0x13   :  { %131 = vmatmul.msk.f32.vlgmr.msra.gmra.mxu0 %vm66_vm0, %v62_v7  ;;  %94 = vmatpush.msra.mxu1 %v57_v8 }
  0x15   :  { %95 = vmatpush.msra.mxu1 %v56_v9 }
  0x17   :  { %96 = vmatpush.msra.mxu1 %v55_v10 }
  0x19   :  { %97 = vmatpush.msra.mxu1 %v54_v11 }
  0x1b   :  { %98 = vmatpush.msra.mxu1 %v53_v12 }
  0x1d   :  { %99 = vmatpush.msra.mxu1 %v52_v13 }
  0x1f   :  { %100 = vmatpush.msra.mxu1 %v51_v14 }
  0x21   :  { %101 = vmatpush.msra.mxu1 %v50_v15 }
  0x23   :  { %102 = vmatpush.msra.mxu1 %v49_v16 }
  0x25   :  { %103 = vmatpush.msra.mxu1 %v48_v0 }
  0x27   :  { %104 = vmatpush.msra.mxu1 %v47_v1 }
  0x29   :  { %105 = vmatpush.msra.mxu1 %v46_v3 }
  0x2b   :  { %106 = vmatpush.msra.mxu1 %v45_v6 }
  0x90   :  { %v87_v18 = vpop.f32.mrf.mxu0 }
  0x91   :  { %v88_v19 = vadd.f32 %v137_v17, %v87_v18 }
  0x93   :  { %v90_v20 = vmax.f32 %v88_v19, 0.0 }
  0x95   :  { %107 = vmatmul.f32.vlgmr.msra.gmra.mxu1 %v90_v20 }
 0x112   :  { %v108_v21 = vpop.f32.mrf.mxu1 }
 0x113   :  { %v109_v22 = vadd.f32 %v137_v17, %v108_v21 }
 0x115   :  { %v111_v23 = vmax.f32 %v109_v22, 0.0 }
 0x117   :  { %112 = vst.msk [vmem:[#allocation7] sm:$0xff] %vm66_vm0, %v111_v23 }
 0x118   :  { %123 = dma.vmem_to_hbm [thread:$0]  %s119_s25, 128, %s121_s28, [#allocation4]  }
 0x119   :  { %214 = dma.done.wait [#allocation4], 128  }
 0x11a   :  { %215 = vsyncadd [#allocation4], 4294967168 }
 0x11b   :  { %128 = vsyncpa [#allocation3], 1 }
 0x11c   :  { %129 = vsyncpa [#allocation6], 1 }
 0x11d   :  { %130 = vsyncpa [#allocation4], 1 }

</bundles_post_ra>
